<compile_context>
chip_gen: v7x
topology: tpu7x:2x2x1
jax: 0.10.0
libtpu: 0.0.40
codegen_flags: <defaults>
</compile_context>

<pallas_src>
import jax
import jax.numpy as jnp
from jax.experimental import pallas as pl
from jax.experimental.pallas import tpu as pltpu

_CLAMP_MIN = -128.0   # -(2**(8-1))
_CLAMP_MAX = 127.0    #  2**(8-1) - 1
_LANE = 128


def _add_clamp_kernel(x_ref, res_ref, o_ref):
    s = x_ref[...] + res_ref[...]
    lo = jnp.asarray(_CLAMP_MIN, dtype=s.dtype)
    hi = jnp.asarray(_CLAMP_MAX, dtype=s.dtype)
    o_ref[...] = jnp.minimum(jnp.maximum(s, lo), hi).astype(o_ref.dtype)


def _add_clamp_2d(x2, r2, tile_rows):
    """Run the elementwise add+clamp over a lane-dense (rows, 128) slab."""
    rows, lane = x2.shape
    # Block row count: either a multiple of 8 (tile_rows) or the full extent
    # (rows), both of which satisfy the (8, 128) BlockSpec constraint.
    tile = min(tile_rows, rows)
    grid = (pl.cdiv(rows, tile),)
    return pl.pallas_call(
        _add_clamp_kernel,
        out_shape=jax.ShapeDtypeStruct((rows, lane), x2.dtype),
        grid_spec=pl.GridSpec(
            grid=grid,
            in_specs=[
                pl.BlockSpec((tile, lane), lambda i: (i, 0)),
                pl.BlockSpec((tile, lane), lambda i: (i, 0)),
            ],
            out_specs=pl.BlockSpec((tile, lane), lambda i: (i, 0)),
        ),
        compiler_params=pltpu.CompilerParams(
            dimension_semantics=("parallel",),
        ),
    )(x2, r2)


def ai85_add(x, res, *, tile_rows=1024):
    """x, res: NCHW arrays of identical shape. Returns clamp(x+res, -128, 127)."""
    assert x.shape == res.shape, "ai85_add requires matching shapes (no broadcast)"
    orig_shape = x.shape
    n_elem = x.size

    if n_elem % _LANE == 0:
        # Fast path: no padding, no output slice — reshapes are layout-free.
        rows = n_elem // _LANE
        out2 = _add_clamp_2d(x.reshape(rows, _LANE), res.reshape(rows, _LANE),
                             tile_rows)
        return out2.reshape(orig_shape)

    # Rare fallback: element count not a multiple of 128. Pad the flattened
    # tail up to a lane boundary (pad value 0 is inside the clamp range, and
    # padded lanes are discarded by the final slice).
    n_pad = (-n_elem) % _LANE
    rows = (n_elem + n_pad) // _LANE
    xf = jnp.pad(x.reshape(-1), (0, n_pad)).reshape(rows, _LANE)
    rf = jnp.pad(res.reshape(-1), (0, n_pad)).reshape(rows, _LANE)
    out2 = _add_clamp_2d(xf, rf, tile_rows)
    return out2.reshape(-1)[:n_elem].reshape(orig_shape)


if __name__ == "__main__":
    key = jax.random.PRNGKey(0)
    k1, k2 = jax.random.split(key)

    # Small NCHW shapes consistent with the module (pure elementwise op).
    N, C, H, W = 2, 4, 16, 16
    # Scale so that some sums land outside [-128, 127] and get clamped.
    x = jax.random.normal(k1, (N, C, H, W), dtype=jnp.float32) * 100.0
    res = jax.random.normal(k2, (N, C, H, W), dtype=jnp.float32) * 100.0

    out = ai85_add(x, res)
    out = jax.block_until_ready(out)

    # Reference check against plain JAX semantics of the PyTorch module.
    ref = jnp.clip(x + res, -128.0, 127.0)
    assert out.shape == (N, C, H, W)
    assert jnp.allclose(out, ref, atol=0.0, rtol=0.0), "mismatch vs reference"

    print("KERNEL_OK")
</pallas_src>

<mosaic_0001>
module attributes {stable_mosaic.version = 11 : i64} {
  func.func @_add_clamp_kernel(%arg0: i32, %arg1: memref<16x128xf32, #tpu.memory_space<vmem>>, %arg2: memref<16x128xf32, #tpu.memory_space<vmem>>, %arg3: memref<16x128xf32, #tpu.memory_space<vmem>>) attributes {dimension_semantics = [#tpu.dimension_semantics<parallel>], iteration_bounds = array<i64: 1>, scalar_prefetch = 0 : i64, scratch_operands = 0 : i64, tpu.core_type = #tpu.core_type<tc>, window_params = [{transform_indices = @transform_0, window_bounds = array<i64: 16, 128>}, {transform_indices = @transform_1, window_bounds = array<i64: 16, 128>}, {transform_indices = @transform_2, window_bounds = array<i64: 16, 128>}]} {
    %c0 = arith.constant 0 : index
    %c0_0 = arith.constant 0 : index
    %0 = vector.load %arg1[%c0, %c0_0] : memref<16x128xf32, #tpu.memory_space<vmem>>, vector<16x128xf32>
    %c0_1 = arith.constant 0 : index
    %c0_2 = arith.constant 0 : index
    %1 = vector.load %arg2[%c0_1, %c0_2] : memref<16x128xf32, #tpu.memory_space<vmem>>, vector<16x128xf32>
    %2 = arith.addf %0, %1 : vector<16x128xf32>
    %cst = arith.constant -1.280000e+02 : f32
    %3 = vector.broadcast %cst : f32 to vector<16x128xf32>
    %4 = arith.maximumf %2, %3 : vector<16x128xf32>
    %cst_3 = arith.constant 1.270000e+02 : f32
    %5 = vector.broadcast %cst_3 : f32 to vector<16x128xf32>
    %6 = arith.minimumf %4, %5 : vector<16x128xf32>
    %c0_4 = arith.constant 0 : index
    %c0_5 = arith.constant 0 : index
    %7 = vector.load %arg3[%c0_4, %c0_5] : memref<16x128xf32, #tpu.memory_space<vmem>>, vector<16x128xf32>
    tpu.vector_store %arg3[%c0_4, %c0_5], %6 {strides = array<i32>} : memref<16x128xf32, #tpu.memory_space<vmem>>, vector<16x128xf32>,
    return
  }
  func.func @transform_0(%arg0: i32) -> (i32, i32) {
    %c0_i32 = arith.constant 0 : i32
    %c0_i32_0 = arith.constant 0 : i32
    return %arg0, %c0_i32 : i32, i32
  }
  func.func @transform_1(%arg0: i32) -> (i32, i32) {
    %c0_i32 = arith.constant 0 : i32
    %c0_i32_0 = arith.constant 0 : i32
    return %arg0, %c0_i32 : i32, i32
  }
  func.func @transform_2(%arg0: i32) -> (i32, i32) {
    %c0_i32 = arith.constant 0 : i32
    %c0_i32_0 = arith.constant 0 : i32
    return %arg0, %c0_i32 : i32, i32
  }
}

</mosaic_0001>

<bundles_post_ra>
// kernel: tpu_custom_call.1
= control target key start
LH: loop header
LB: loop body
LE: loop exit
PB: predicated region body
PF: predicated region fallthrough
CT: control target
= control target key end

     0   :  { %7 = vsyncpa [#allocation3], 0  ;;  %s212_s0 = inlined_call_operand.hbm [shape: f32[16,128], index: 0, kind: input, shape index: {}]   ;;  %s213_s1 = inlined_call_operand.hbm [shape: f32[16,128], index: 1, kind: input, shape index: {}]   ;;  %s214_s2 = inlined_call_operand.hbm [shape: f32[16,128], index: 2, kind: output, shape index: {}]  }
   0x1   :  { %8 = vsyncpa [#allocation6], 0 }
   0x2   :  { %9 = vsyncpa [#allocation4], 0  ;;  %s147_s9 = smov [#allocation2]   ;;  %s75_s13 = scalar_lea.hbm %s212_s0, 256 }
   0x3   :  { %s15_s10 = sshll.u32 %s147_s9, 4  ;;  %p76_p0 = scmp.ne.s32.totalorder %s212_s0, %s75_s13  ;;  %s16_s10 = int_to_ptr.vmem [resolvable:$true] %s15_s10 }
   0x4   :  { %p79_p1 = scmp.lt.u32.totalorder %s75_s13, %s212_s0 }
   0x6   :  { %p81_p2 = pnand %p79_p1, %p76_p0 }
   0x8   :  { %84 = shalt.err (!%p81_p2)
}
   0x9   :  { %s85_s18 = scalar_lea.vmem %s16_s10, 256  ;;  %p90_p4 = scmp.lt.s32.totalorder %s16_s10, %s16_s10 }
   0xa   :  { %p86_p3 = scmp.ne.s32.totalorder %s16_s10, %s85_s18  ;;  %p91_p5 = scmp.lt.s32.totalorder %s85_s18, %s85_s18 }
   0xc   :  { %p92_p6 = por %p91_p5, %p90_p4 }
   0xe   :  { %p93_p7 = pnand %p92_p6, %p86_p3 }
  0x10   :  { %96 = shalt.err (!%p93_p7)
}
  0x11   :  { %s148_s19 = smov 128   ;;  %s149_s20 = smov 8  }
  0x12   :  { %21 = dma.hbm_to_vmem [thread:$0]  %s212_s0, 256, %s16_s10, [#allocation3], %s148_s19, %s148_s19, %s149_s20  }
  0x13   :  { %s150_s23 = smov [#allocation5]   ;;  %s97_s27 = scalar_lea.hbm %s213_s1, 256 }
  0x14   :  { %s27_s24 = sshll.u32 %s150_s23, 4  ;;  %p98_p8 = scmp.ne.s32.totalorder %s213_s1, %s97_s27  ;;  %s28_s24 = int_to_ptr.vmem [resolvable:$true] %s27_s24 }
  0x15   :  { %p101_p9 = scmp.lt.u32.totalorder %s97_s27, %s213_s1 }
  0x17   :  { %p103_p10 = pnand %p101_p9, %p98_p8 }
  0x19   :  { %106 = shalt.err (!%p103_p10)
}
  0x1a   :  { %s107_s4 = scalar_lea.vmem %s28_s24, 256  ;;  %p112_p12 = scmp.lt.s32.totalorder %s28_s24, %s28_s24 }
  0x1b   :  { %p108_p11 = scmp.ne.s32.totalorder %s28_s24, %s107_s4  ;;  %p113_p13 = scmp.lt.s32.totalorder %s107_s4, %s107_s4 }
  0x1d   :  { %p114_p0 = por %p113_p13, %p112_p12 }
  0x1f   :  { %p115_p1 = pnand %p114_p0, %p108_p11 }
  0x21   :  { %118 = shalt.err (!%p115_p1)
}
  0x22   :  { %33 = dma.hbm_to_vmem [thread:$0]  %s213_s1, 256, %s28_s24, [#allocation6], %s148_s19, %s148_s19, %s149_s20  }
  0x23   :  { %141 = dma.done.wait [#allocation3], 256  }
  0x24   :  { %142 = vsyncadd [#allocation3], 4294967040 }
  0x25   :  { %143 = dma.done.wait [#allocation6], 256  }
  0x26   :  { %144 = vsyncadd [#allocation6], 4294967040  ;;  %v40_v0 = vld [vmem:[#allocation2] sm:$0xff]  ;;  %v42_v1 = vld [vmem:[#allocation5] sm:$0xff]  ;;  %s151_s6 = smov [#allocation7]  }
  0x27   :  { %v41_v2 = vld [vmem:[#allocation2 + $0x8] sm:$0xff]  ;;  %v44_v3 = vadd.f32 %v42_v1, %v40_v0  ;;  %v43_v4 = vld [vmem:[#allocation5 + $0x8] sm:$0xff]  ;;  %s57_s7 = sshll.u32 %s151_s6, 4  ;;  %s58_s7 = int_to_ptr.vmem [resolvable:$true] %s57_s7 }
  0x28   :  { %v45_v5 = vadd.f32 %v43_v4, %v41_v2  ;;  %s119_s1 = scalar_lea.vmem %s58_s7, 256  ;;  %p124_p3 = scmp.lt.s32.totalorder %s58_s7, %s58_s7 }
  0x29   :  { %v46_v6 = vmax.f32 %v44_v3, -128.0  ;;  %p120_p2 = scmp.ne.s32.totalorder %s58_s7, %s119_s1  ;;  %p125_p4 = scmp.lt.s32.totalorder %s119_s1, %s119_s1 }
  0x2a   :  { %v47_v7 = vmax.f32 %v45_v5, -128.0 }
  0x2b   :  { %v48_v8 = vmin.f32 %v46_v6, 127.0  ;;  %p126_p5 = por %p125_p4, %p124_p3 }
  0x2c   :  { %v49_v9 = vmin.f32 %v47_v7, 127.0 }
  0x2d   :  { %50 = vst [vmem:[#allocation7] sm:$0xff] %v48_v8  ;;  %p127_p6 = pnand %p126_p5, %p120_p2 }
  0x2e   :  { %51 = vst [vmem:[#allocation7 + $0x8] sm:$0xff] %v49_v9 }
  0x2f   :  { %130 = shalt.err (!%p127_p6)
}
  0x30   :  { %s131_s10 = scalar_lea.hbm %s214_s2, 256 }
  0x31   :  { %p132_p7 = scmp.ne.s32.totalorder %s214_s2, %s131_s10  ;;  %p135_p8 = scmp.lt.u32.totalorder %s131_s10, %s214_s2 }
  0x33   :  { %p137_p9 = pnand %p135_p8, %p132_p7 }
  0x35   :  { %140 = shalt.err (!%p137_p9)
}
  0x36   :  { %63 = dma.vmem_to_hbm [thread:$0]  %s58_s7, 256, %s214_s2, [#allocation4], %s148_s19, %s148_s19, %s149_s20  }
  0x37   :  { %145 = dma.done.wait [#allocation4], 256  }
  0x38   :  { %146 = vsyncadd [#allocation4], 4294967040 }
  0x39   :  { %67 = vsyncpa [#allocation3], 1 }
  0x3a   :  { %68 = vsyncpa [#allocation6], 1 }
  0x3b   :  { %69 = vsyncpa [#allocation4], 1 }

</bundles_post_ra>
